<compile_context>
chip_gen: v7x
topology: tpu7x:2x2x1
jax: 0.10.0
libtpu: 0.0.40
codegen_flags: <defaults>
</compile_context>

<pallas_src>
import math

import jax
import jax.numpy as jnp
from jax.experimental import pallas as pl
from jax.experimental.pallas import tpu as pltpu


_GELU_C = math.sqrt(2.0 / math.pi)


def _new_gelu_f32(h):
    # tanh-approx GELU (matches the PyTorch reference), computed in f32.
    # h*h*h -> VALU muls, tanh -> EUP slot, so this hides under the MXU.
    return 0.5 * h * (1.0 + jnp.tanh(_GELU_C * (h + 0.044715 * (h * h * h))))


# ----------------------------------------------------------------------------- kernels
def _mlp_kernel_resident(x_ref, w1_ref, b1_ref, w2_ref, b2_ref, o_ref):
    # Weights fully VMEM-resident: single grid axis over row tiles, no accumulator.
    h = jnp.dot(x_ref[...], w1_ref[...], preferred_element_type=jnp.float32)
    h = _new_gelu_f32(h + b1_ref[...].astype(jnp.float32))
    out = jnp.dot(h.astype(w2_ref.dtype), w2_ref[...],
                  preferred_element_type=jnp.float32)
    # TODO(synk): Dropout is identity in eval mode / p=0.0; training-mode dropout would use
    # pltpu.prng_seed + pltpu.prng_random_bits (per-tile offset) before this store.
    o_ref[...] = (out + b2_ref[...].astype(jnp.float32)).astype(o_ref.dtype)


def _mlp_kernel_stream_scratch(x_ref, w1_ref, b1_ref, w2_ref, b2_ref, o_ref, acc_ref):
    # Hidden dim streamed in tiles; f32 scratch accumulator (used for non-f32 outputs).
    h_idx = pl.program_id(1)

    @pl.when(h_idx == 0)
    def _():
        acc_ref[...] = jnp.zeros_like(acc_ref)

    h = jnp.dot(x_ref[...], w1_ref[...], preferred_element_type=jnp.float32)
    h = _new_gelu_f32(h + b1_ref[...].astype(jnp.float32))
    acc_ref[...] += jnp.dot(h.astype(w2_ref.dtype), w2_ref[...],
                            preferred_element_type=jnp.float32)

    @pl.when(h_idx == pl.num_programs(1) - 1)
    def _():
        o_ref[...] = (acc_ref[...] + b2_ref[...].astype(jnp.float32)).astype(o_ref.dtype)


def _mlp_kernel_stream_inplace(x_ref, w1_ref, b1_ref, w2_ref, b2_ref, o_ref):
    # f32 output: o_ref is resident across the h axis -> accumulate directly, no scratch.
    h_idx = pl.program_id(1)

    @pl.when(h_idx == 0)
    def _():
        o_ref[...] = jnp.broadcast_to(b2_ref[...], o_ref.shape).astype(o_ref.dtype)

    h = jnp.dot(x_ref[...], w1_ref[...], preferred_element_type=jnp.float32)
    h = _new_gelu_f32(h + b1_ref[...].astype(jnp.float32))
    o_ref[...] += jnp.dot(h.astype(w2_ref.dtype), w2_ref[...],
                          preferred_element_type=jnp.float32)


# ----------------------------------------------------------------------------- helpers
def _cdiv(a, b):
    return (a + b - 1) // b


def _round_up(a, b):
    return _cdiv(a, b) * b


def _align_down(a, b):
    return max(b, (a // b) * b)


def _pick_tile(total, target, align):
    """Largest t <= target with t % align == 0 and total % t == 0; else the full extent."""
    if total <= target:
        return total
    t = (target // align) * align
    while t >= align:
        if total % t == 0:
            return t
        t -= align
    return total


def _vmem_capacity_bytes():
    try:
        return int(pltpu.get_tpu_info().vmem_capacity_bytes)
    except Exception:
        return 64 << 20  # conservative: assume v7x per-TensorCore VMEM


# ----------------------------------------------------------------------------- wrapper
def mlp_pallas(x, w1, b1, w2, b2, *, tm=None, th=None, cast_to_bf16=False):
    """x: (B, T, C); w1: (C, 4C); b1: (4C,); w2: (4C, C); b2: (C,).  Weights stored (in, out)."""
    B, T, C = x.shape
    H = w1.shape[1]
    M = B * T
    out_dtype = x.dtype

    if cast_to_bf16:
        # bf16 MXU operands (accumulation stays f32): ~2-4x MXU rate + half the weight
        # streaming bytes.  Off by default to keep f32 parity with the reference.
        x, w1, w2 = (a.astype(jnp.bfloat16) for a in (x, w1, w2))

    xb = jnp.dtype(x.dtype).itemsize
    wb = jnp.dtype(w1.dtype).itemsize
    ob = jnp.dtype(out_dtype).itemsize

    # --- generation-aware sizing ------------------------------------------------------
    phys_vmem = _vmem_capacity_bytes()
    big_vmem = phys_vmem >= (100 << 20)  # v5e/v6e: 128 MiB; v7x: 64 MiB per TensorCore
    if big_vmem:
        vmem_cap = phys_vmem - (16 << 20)           # ~112 MiB on v5e/v6e
    else:
        vmem_cap = min(phys_vmem - (8 << 20), 56 << 20)  # headroom under v7x's 64 MiB
    vmem_cap = max(vmem_cap, 32 << 20)

    row_align = 16 if x.dtype == jnp.bfloat16 else 8
    if tm is None:
        # HBM/MXU crossover in the weight-streaming regime:
        # ~700 flop/byte (v6e), ~240 (v5e), ~311 (v7x) -> 1024 rows on big-VMEM chips, 512 on v7x.
        tm = 1024 if big_vmem else 512
    tm = min(tm, _round_up(M, row_align))
    tm = _round_up(tm, row_align)

    def resident_bytes(tm_):
        # double-buffered x/out tiles + (up to) double-buffered full weights + biases
        # + f32 hidden slab (+ cast copy) + Mosaic headroom.
        return (2 * tm_ * C * xb + 2 * tm_ * C * ob
                + 2 * C * H * wb + 2 * H * C * wb + 2 * H * wb + 2 * C * wb
                + tm_ * H * 4 + tm_ * H * wb + (4 << 20))

    def stream_bytes(tm_, th_, scratch_):
        return (2 * tm_ * C * xb + 2 * tm_ * C * ob
                + 2 * C * th_ * wb + 2 * th_ * C * wb + 2 * th_ * wb + 2 * C * wb
                + (tm_ * C * 4 if scratch_ else 0)
                + tm_ * th_ * 4 + tm_ * th_ * wb + (4 << 20))

    # Prefer fully VMEM-resident weights (th == H): W1/W2 are DMA'd from HBM exactly once
    # for the whole grid instead of once per row tile -> MXU-bound regardless of tm.
    resident = False
    if th is None or th == H:
        cand = tm
        floor = min(256, _round_up(M, row_align))
        while cand >= floor and resident_bytes(cand) > vmem_cap:
            nxt = _align_down(cand // 2, row_align)
            if nxt == cand:
                break
            cand = nxt
        if cand >= floor and resident_bytes(cand) <= vmem_cap:
            resident, tm, th = True, cand, H

    use_scratch = False
    if not resident:
        if th is None:
            th = 2048 if big_vmem else 1024
        th = _pick_tile(H, min(th, H), 128)
        use_scratch = out_dtype != jnp.float32
        while tm > row_align and stream_bytes(tm, th, use_scratch) > vmem_cap:
            tm = _align_down(tm // 2, row_align)

    # Keep >=2 row tiles when weights are resident so the "parallel" row axis can shard
    # across the two v7x TensorCores (free: no extra weight streaming).
    if resident and _cdiv(M, tm) == 1 and M > row_align:
        half = _align_down(tm // 2, row_align)
        if _cdiv(M, half) >= 2:
            tm = half

    # Pad rows so the grid tiles M exactly (handles awkward B*T); padded rows are dropped.
    M_pad = _round_up(M, tm)
    x2 = x.reshape(M, C)
    if M_pad != M:
        x2 = jnp.pad(x2, ((0, M_pad - M), (0, 0)))
    b1_2 = b1.reshape(1, H)
    b2_2 = b2.reshape(1, C)

    rows = M_pad // tm
    h_tiles = H // th

    needed = resident_bytes(tm) if resident else stream_bytes(tm, th, use_scratch)
    vmem_limit = int(max(min(vmem_cap, needed + (8 << 20)), 32 << 20))

    # Honest cost estimate: weights are re-read once per row tile when streaming.
    weight_bytes = C * H * wb + H * C * wb + H * wb + C * wb
    cost = pl.CostEstimate(
        flops=4 * M_pad * C * H,
        transcendentals=M_pad * H,
        bytes_accessed=(M_pad * C * (xb + ob)
                        + weight_bytes * (1 if resident else rows)),
    )

    if resident:
        grid = (rows,)
        in_specs = [
            pl.BlockSpec((tm, C), lambda i: (i, 0)),   # x row tile
            pl.BlockSpec((C, H), lambda i: (0, 0)),    # W1, resident (fetched once)
            pl.BlockSpec((1, H), lambda i: (0, 0)),    # b1
            pl.BlockSpec((H, C), lambda i: (0, 0)),    # W2, resident
            pl.BlockSpec((1, C), lambda i: (0, 0)),    # b2
        ]
        out_specs = pl.BlockSpec((tm, C), lambda i: (i, 0))
        kernel = _mlp_kernel_resident
        scratch_shapes = []
        dim_sem = ("parallel",)
    else:
        grid = (rows, h_tiles)
        in_specs = [
            pl.BlockSpec((tm, C), lambda i, h: (i, 0)),  # x: constant over h
            pl.BlockSpec((C, th), lambda i, h: (0, h)),  # W1 tile streams over h
            pl.BlockSpec((1, th), lambda i, h: (0, h)),  # b1 tile
            pl.BlockSpec((th, C), lambda i, h: (h, 0)),  # W2 tile streams over h
            pl.BlockSpec((1, C), lambda i, h: (0, 0)),   # b2
        ]
        out_specs = pl.BlockSpec((tm, C), lambda i, h: (i, 0))
        if use_scratch:
            kernel = _mlp_kernel_stream_scratch
            scratch_shapes = [pltpu.VMEM((tm, C), jnp.float32)]
        else:
            kernel = _mlp_kernel_stream_inplace
            scratch_shapes = []
        dim_sem = ("parallel", "arbitrary")

    out = pl.pallas_call(
        kernel,
        out_shape=jax.ShapeDtypeStruct((M_pad, C), out_dtype),
        grid_spec=pltpu.PrefetchScalarGridSpec(
            num_scalar_prefetch=0,
            grid=grid,
            in_specs=in_specs,
            out_specs=out_specs,
            scratch_shapes=scratch_shapes,
        ),
        compiler_params=pltpu.CompilerParams(
            dimension_semantics=dim_sem,
            vmem_limit_bytes=vmem_limit,
        ),
        cost_estimate=cost,
    )(x2, w1, b1_2, w2, b2_2)

    if M_pad != M:
        out = out[:M]
    return out.reshape(B, T, C)


def mlp_reference(x, w1, b1, w2, b2):
    h = jnp.dot(x, w1) + b1
    h = 0.5 * h * (1.0 + jnp.tanh(_GELU_C * (h + 0.044715 * (h * h * h))))
    return jnp.dot(h, w2) + b2


if __name__ == "__main__":
    # Small config consistent with the module: n_embd=32, bias=True, dropout=0.0 (eval).
    B, T, C = 2, 8, 32
    H = 4 * C

    key = jax.random.PRNGKey(0)
    kx, k1, k2, k3, k4 = jax.random.split(key, 5)

    x = jax.random.normal(kx, (B, T, C), dtype=jnp.float32)
    # Deterministic init mimicking nn.Linear default (uniform +/- 1/sqrt(fan_in)),
    # stored pre-transposed as (in, out).
    w1 = jax.random.uniform(k1, (C, H), dtype=jnp.float32,
                            minval=-1.0 / math.sqrt(C), maxval=1.0 / math.sqrt(C))
    b1 = jax.random.uniform(k2, (H,), dtype=jnp.float32,
                            minval=-1.0 / math.sqrt(C), maxval=1.0 / math.sqrt(C))
    w2 = jax.random.uniform(k3, (H, C), dtype=jnp.float32,
                            minval=-1.0 / math.sqrt(H), maxval=1.0 / math.sqrt(H))
    b2 = jax.random.uniform(k4, (C,), dtype=jnp.float32,
                            minval=-1.0 / math.sqrt(H), maxval=1.0 / math.sqrt(H))

    out = mlp_pallas(x, w1, b1, w2, b2)
    out = jax.block_until_ready(out)

    ref = mlp_reference(x, w1, b1, w2, b2)
    assert out.shape == (B, T, C)
    assert jnp.allclose(out, ref, atol=1e-5, rtol=1e-5), "mismatch vs reference"

    print("KERNEL_OK")
</pallas_src>

<mosaic_0001>
module attributes {stable_mosaic.version = 11 : i64} {
  func.func @_mlp_kernel_resident(%arg0: i32, %arg1: memref<8x32xf32, #tpu.memory_space<vmem>>, %arg2: memref<32x128xf32, #tpu.memory_space<vmem>>, %arg3: memref<1x128xf32, #tpu.memory_space<vmem>>, %arg4: memref<128x32xf32, #tpu.memory_space<vmem>>, %arg5: memref<1x32xf32, #tpu.memory_space<vmem>>, %arg6: memref<8x32xf32, #tpu.memory_space<vmem>>) attributes {dimension_semantics = [#tpu.dimension_semantics<parallel>], iteration_bounds = array<i64: 2>, scalar_prefetch = 0 : i64, scratch_operands = 0 : i64, tpu.core_type = #tpu.core_type<tc>, window_params = [{transform_indices = @transform_0, window_bounds = array<i64: 8, 32>}, {pipeline_mode = #tpu.pipeline_mode<synchronous>, transform_indices = @transform_1, window_bounds = array<i64: 32, 128>}, {pipeline_mode = #tpu.pipeline_mode<synchronous>, transform_indices = @transform_2, window_bounds = array<i64: 1, 128>}, {pipeline_mode = #tpu.pipeline_mode<synchronous>, transform_indices = @transform_3, window_bounds = array<i64: 128, 32>}, {pipeline_mode = #tpu.pipeline_mode<synchronous>, transform_indices = @transform_4, window_bounds = array<i64: 1, 32>}, {transform_indices = @transform_5, window_bounds = array<i64: 8, 32>}]} {
    %c0 = arith.constant 0 : index
    %c0_0 = arith.constant 0 : index
    %0 = vector.load %arg1[%c0, %c0_0] : memref<8x32xf32, #tpu.memory_space<vmem>>, vector<8x32xf32>
    %c0_1 = arith.constant 0 : index
    %c0_2 = arith.constant 0 : index
    %1 = vector.load %arg2[%c0_1, %c0_2] : memref<32x128xf32, #tpu.memory_space<vmem>>, vector<32x128xf32>
    %cst = arith.constant dense<0.000000e+00> : vector<8x128xf32>
    %2 = tpu.matmul %0, %1, %cst {dimension_numbers = #tpu.dot_dimension_numbers<[1], [0], [0], [1], [0, 0, 1, 1], [], []>} : vector<8x32xf32>, vector<32x128xf32>, vector<8x128xf32> -> vector<8x128xf32>
    %c0_3 = arith.constant 0 : index
    %c0_4 = arith.constant 0 : index
    %3 = vector.load %arg3[%c0_3, %c0_4] : memref<1x128xf32, #tpu.memory_space<vmem>>, vector<1x128xf32>
    %4 = vector.broadcast %3 : vector<1x128xf32> to vector<8x128xf32>
    %5 = arith.addf %2, %4 : vector<8x128xf32>
    %cst_5 = arith.constant 5.000000e-01 : f32
    %6 = vector.broadcast %cst_5 : f32 to vector<8x128xf32>
    %7 = arith.mulf %6, %5 : vector<8x128xf32>
    %8 = arith.mulf %5, %5 : vector<8x128xf32>
    %9 = arith.mulf %8, %5 : vector<8x128xf32>
    %cst_6 = arith.constant 4.471500e-02 : f32
    %10 = vector.broadcast %cst_6 : f32 to vector<8x128xf32>
    %11 = arith.mulf %10, %9 : vector<8x128xf32>
    %12 = arith.addf %5, %11 : vector<8x128xf32>
    %cst_7 = arith.constant 0.797884583 : f32
    %13 = vector.broadcast %cst_7 : f32 to vector<8x128xf32>
    %14 = arith.mulf %13, %12 : vector<8x128xf32>
    %15 = math.tanh %14 : vector<8x128xf32>
    %cst_8 = arith.constant 1.000000e+00 : f32
    %16 = vector.broadcast %cst_8 : f32 to vector<8x128xf32>
    %17 = arith.addf %16, %15 : vector<8x128xf32>
    %18 = arith.mulf %7, %17 : vector<8x128xf32>
    %c0_9 = arith.constant 0 : index
    %c0_10 = arith.constant 0 : index
    %19 = vector.load %arg4[%c0_9, %c0_10] : memref<128x32xf32, #tpu.memory_space<vmem>>, vector<128x32xf32>
    %cst_11 = arith.constant dense<0.000000e+00> : vector<8x32xf32>
    %20 = tpu.matmul %18, %19, %cst_11 {dimension_numbers = #tpu.dot_dimension_numbers<[1], [0], [0], [1], [0, 0, 1, 1], [], []>} : vector<8x128xf32>, vector<128x32xf32>, vector<8x32xf32> -> vector<8x32xf32>
    %c0_12 = arith.constant 0 : index
    %c0_13 = arith.constant 0 : index
    %21 = vector.load %arg5[%c0_12, %c0_13] : memref<1x32xf32, #tpu.memory_space<vmem>>, vector<1x32xf32>
    %22 = vector.broadcast %21 : vector<1x32xf32> to vector<8x32xf32>
    %23 = arith.addf %20, %22 : vector<8x32xf32>
    %c0_14 = arith.constant 0 : index
    %c0_15 = arith.constant 0 : index
    %24 = vector.load %arg6[%c0_14, %c0_15] : memref<8x32xf32, #tpu.memory_space<vmem>>, vector<8x32xf32>
    tpu.vector_store %arg6[%c0_14, %c0_15], %23 {strides = array<i32>} : memref<8x32xf32, #tpu.memory_space<vmem>>, vector<8x32xf32>,
    return
  }
  func.func @transform_0(%arg0: i32) -> (i32, i32) {
    %c0_i32 = arith.constant 0 : i32
    %c0_i32_0 = arith.constant 0 : i32
    return %arg0, %c0_i32 : i32, i32
  }
  func.func @transform_1(%arg0: i32) -> (i32, i32) {
    %c0_i32 = arith.constant 0 : i32
    %c0_i32_0 = arith.constant 0 : i32
    %c0_i32_1 = arith.constant 0 : i32
    return %c0_i32, %c0_i32_0 : i32, i32
  }
  func.func @transform_2(%arg0: i32) -> (i32, i32) {
    %c0_i32 = arith.constant 0 : i32
    %c0_i32_0 = arith.constant 0 : i32
    %c0_i32_1 = arith.constant 0 : i32
    return %c0_i32, %c0_i32_0 : i32, i32
  }
  func.func @transform_3(%arg0: i32) -> (i32, i32) {
    %c0_i32 = arith.constant 0 : i32
    %c0_i32_0 = arith.constant 0 : i32
    %c0_i32_1 = arith.constant 0 : i32
    return %c0_i32, %c0_i32_0 : i32, i32
  }
  func.func @transform_4(%arg0: i32) -> (i32, i32) {
    %c0_i32 = arith.constant 0 : i32
    %c0_i32_0 = arith.constant 0 : i32
    %c0_i32_1 = arith.constant 0 : i32
    return %c0_i32, %c0_i32_0 : i32, i32
  }
  func.func @transform_5(%arg0: i32) -> (i32, i32) {
    %c0_i32 = arith.constant 0 : i32
    %c0_i32_0 = arith.constant 0 : i32
    return %arg0, %c0_i32 : i32, i32
  }
}

</mosaic_0001>

<bundles_post_ra>
// kernel: tpu_custom_call.1
= control target key start
LH: loop header
LB: loop body
LE: loop exit
PB: predicated region body
PF: predicated region fallthrough
CT: control target
= control target key end

     0   :  { %10 = vsyncpa [#allocation3], 0  ;;  %s903_s0 = inlined_call_operand.vmem [shape: f32[16,32], index: 0, kind: input, shape index: {}]   ;;  %s904_s1 = inlined_call_operand.vmem [shape: f32[32,128], index: 1, kind: input, shape index: {}]   ;;  %s905_s2 = inlined_call_operand.vmem [shape: f32[1,128], index: 2, kind: input, shape index: {}]   ;;  %s906_s3 = inlined_call_operand.vmem [shape: f32[128,32], index: 3, kind: input, shape index: {}]   ;;  %s907_s4 = inlined_call_operand.vmem [shape: f32[1,32], index: 4, kind: input, shape index: {}]   ;;  %s908_s5 = inlined_call_operand.hbm [shape: f32[16,32], index: 5, kind: output, shape index: {}]  }
   0x1   :  { %12 = vsyncpa [#allocation3 + $0x1], 0  ;;  %s735_s18 = smov 0   ;;  %s737_s19 = smov 0  }
   0x2   :  { %s739_s20 = smov 0   ;;  %s741_s21 = smov 0  }
   0x3 LB: > { %s756_s22 = sadd.s32 4294967295, %s699_s21   ;;  %s482_s23 = sadd.s32 4294967294, %s699_s21   ;;  %s699_s21 = sphi %s741_s21, %s914_s21   ;;  %s695_s20 = sphi %s739_s20, %s913_s20   ;;  %s691_s19 = sphi %s737_s19, %s912_s19   ;;  %s687_s18 = sphi %s735_s18, %s911_s18  }
   0x4   : > { %s760_s24 = sadd.s32 1, %s699_s21   ;;  %s135_s25 = sadd.s32 1, %s695_s20 }
   0x5   : > { %s132_s26 = ssub.s32 %s699_s21, %s760_s24  ;;  %p145_p0 = scmp.ne.s32.totalorder %s695_s20, %s691_s19 }
   0x6   : > { %p133_p1 = scmp.eq.s32.totalorder %s132_s26, 0  ;;  %p146_p2 = scmp.eq.s32.totalorder %s756_s22, 1 }
   0x7   : > { %p151_p3 = scmp.ne.s32.totalorder %s691_s19, %s687_s18  ;;  %p152_p4 = scmp.eq.s32.totalorder %s482_s23, 1 }
   0x8   : > { %s771_s27 = scalar_select %p133_p1, %s695_s20, %s135_s25  }
   0x9   : > { %p773_p5 = por %p146_p2, %p145_p0  ;;  %p777_p6 = por %p152_p4, %p151_p3 }
   0xa   : > { %p485_p7 = scmp.ge.s32.totalorder %s699_s21, 1  ;;  %p189_p8 = scmp.lt.s32.totalorder %s699_s21, 3 }
   0xc   : > { %p190_p9 = pnand %p485_p7, %p189_p8 }
   0xd   : > { %v221_v0 = vld [vmem:[%s904_s1] sm:$0xff] (!%p190_p9)  ;;  %v222_v1 = vld [vmem:[%s904_s1 + $0x8] sm:$0xff] (!%p190_p9)  ;;  %v223_v2 = vld [vmem:[%s904_s1 + $0x10] sm:$0xff] (!%p190_p9)  ;;  %v701_v3 = vmov (!%p190_p9), 0.0|0.0   ;;  %vm702_vm0 = vmmov (!%p190_p9), 0   ;;  %v703_v6 = vmov (!%p190_p9), 0.0  }
   0xe   : > { %193 = sbr.rel (%p190_p9) target bundleno = 493 (0x1ed), region = 40  ;;  %563 = vmatprep.subr.bf16.mxu0 (!%p190_p9), %v701_v3  ;;  %v564_v4 = vpack.c.bf16 (!%p190_p9), %v222_v1, %v221_v0  ;;  %v224_v5 = vld [vmem:[%s904_s1 + $0x18] sm:$0xff] (!%p190_p9)  ;;  %525 = vmatprep.mubr.msk.f32.mxu0 (!%p190_p9), %vm702_vm0, %v703_v6  ;;  %p216_p10 = scmp.lt.s32.totalorder (!%p190_p9), %s756_s22, 1  ;;  %v315_v7 = vld [vmem:[%s906_s3] sm:$0xff] (!%p190_p9)  ;;  %v316_v8 = vld [vmem:[%s906_s3 + $0x8] sm:$0xff] (!%p190_p9)  ;;  %vm232_vm1 = vcmask (!%p190_p9), 261120  }
   0xf   : > { %569 = vmatprep.subr.bf16.mxu1 (!%p190_p9), %v701_v3  ;;  %v570_v9 = vpack.c.bf16 (!%p190_p9), %v316_v8, %v315_v7  ;;  %560 = vmatprep.mubr.msk.f32.mxu1 (!%p190_p9), %vm702_vm0, %v703_v6  ;;  %v567_v10 = vpack.c.bf16 (!%p190_p9), %v224_v5, %v223_v2  ;;  %v317_v12 = vld [vmem:[%s906_s3 + $0x10] sm:$0xff] (!%p190_p9)  ;;  %v318_v13 = vld [vmem:[%s906_s3 + $0x18] sm:$0xff] (!%p190_p9)  ;;  %v319_v15 = vld [vmem:[%s906_s3 + $0x20] sm:$0xff] (!%p190_p9)  ;;  %s213_s26 = sand.u32 (!%p190_p9), 1, %s691_s19   ;;  %s492_s8 = sshll.u32 (!%p190_p9), %s756_s22, 7 }
  0x10   : > { %565 = vmatpush3.bf16.msra.mxu0 (!%p190_p9), %v564_v4  ;;  %v573_v14 = vpack.c.bf16 (!%p190_p9), %v318_v13, %v317_v12  ;;  %v320_v16 = vld [vmem:[%s906_s3 + $0x28] sm:$0xff] (!%p190_p9)  ;;  %v321_v18 = vld [vmem:[%s906_s3 + $0x30] sm:$0xff] (!%p190_p9)  ;;  %v322_v19 = vld [vmem:[%s906_s3 + $0x38] sm:$0xff] (!%p190_p9)  ;;  %s860_s13 = scalar_lea.hbm (!%p190_p9), %s908_s5, %s492_s8  ;;  %s410_s14 = scalar_lea.sflag (!%p190_p9), [#allocation3], %s213_s26 }
  0x11   : > { %566 = vmatprep.subr.bf16.mxu0 (!%p190_p9), %v701_v3  ;;  %571 = vmatpush3.bf16.msra.mxu1 (!%p190_p9), %v570_v9  ;;  %v576_v17 = vpack.c.bf16 (!%p190_p9), %v320_v16, %v319_v15  ;;  %v579_v20 = vpack.c.bf16 (!%p190_p9), %v322_v19, %v321_v18  ;;  %v323_v21 = vld [vmem:[%s906_s3 + $0x40] sm:$0xff] (!%p190_p9)  ;;  %v324_v22 = vld [vmem:[%s906_s3 + $0x48] sm:$0xff] (!%p190_p9)  ;;  %v325_v24 = vld [vmem:[%s906_s3 + $0x50] sm:$0xff] (!%p190_p9) }
  0x12   : > { %572 = vmatprep.subr.bf16.mxu1 (!%p190_p9), %v701_v3  ;;  %v582_v23 = vpack.c.bf16 (!%p190_p9), %v324_v22, %v323_v21  ;;  %v326_v25 = vld [vmem:[%s906_s3 + $0x58] sm:$0xff] (!%p190_p9)  ;;  %v327_v27 = vld [vmem:[%s906_s3 + $0x60] sm:$0xff] (!%p190_p9)  ;;  %v328_v28 = vld [vmem:[%s906_s3 + $0x68] sm:$0xff] (!%p190_p9) }
  0x13   : > { %v585_v26 = vpack.c.bf16 (!%p190_p9), %v326_v25, %v325_v24  ;;  %v588_v29 = vpack.c.bf16 (!%p190_p9), %v328_v28, %v327_v27  ;;  %v329_v30 = vld [vmem:[%s906_s3 + $0x70] sm:$0xff] (!%p190_p9)  ;;  %v330_v31 = vld [vmem:[%s906_s3 + $0x78] sm:$0xff] (!%p190_p9)  ;;  %v488_v33 = vld [vmem:[%s905_s2] ss:$0 sm:$0xff] (!%p190_p9) }
  0x14   : > { %568 = vmatpush3.bf16.msra.mxu0 (!%p190_p9), %v567_v10  ;;  %v591_v32 = vpack.c.bf16 (!%p190_p9), %v330_v31, %v329_v30  ;;  %v490_v46 = vld [vmem:[%s907_s4] ss:$0 sm:$0xff] (!%p190_p9) }
  0x15   : > { %s217_s17 = scalar_select %p216_p10, %s756_s22, 1  ;;  %574 = vmatpush3.bf16.msra.mxu1 %v573_v14 }
  0x16   : > { %575 = vmatprep.subr.bf16.mxu1 %v701_v3  ;;  %s704_s22 = smov [#allocation2]  }
  0x17   : > { %s487_s23 = sshll.u32 %s217_s17, 3  ;;  %s641_s16 = sshll.u32 %s704_s22, 4  ;;  %s642_s16 = int_to_ptr.vmem [resolvable:$false] %s641_s16 }
  0x18   : > { %s219_s30 = scalar_lea.vmem %s903_s0, %s487_s23  ;;  %s643_s17 = scalar_lea.vmem %s642_s16, 256 }
  0x19   : > { %v220_v11 = vld [vmem:[%s219_s30] sm:$0xff]  ;;  %577 = vmatpush3.bf16.msra.mxu1 %v576_v17  ;;  %s486_s30 = sshll.u32 %s213_s26, 3 }
  0x1a   : > { %526 = vmatmul.mubr.msk.f32.vlgmr.msra.gmra.mrb[0].mxu0 %vm232_vm1, %v220_v11  ;;  %578 = vmatprep.subr.bf16.mxu1 %v701_v3  ;;  %s215_s9 = scalar_lea.vmem [#allocation2], %s486_s30 }
  0x1b   : > { %s423_s10 = sshll.u32 %s215_s9, 4  ;;  %s862_s10 = int_to_ptr.vmem [resolvable:$true] %s423_s10 }
  0x1c   : > { %s637_s15 = scalar_lea.vmem %s862_s10, 128  ;;  %p644_p0 = scmp.lt.s32.totalorder %s862_s10, %s642_s16 }
  0x1d   : > { %580 = vmatpush3.bf16.msra.mxu1 %v579_v20  ;;  %p638_p11 = scmp.ne.s32.totalorder %s862_s10, %s637_s15  ;;  %p645_p1 = scmp.lt.s32.totalorder %s643_s17, %s637_s15 }
  0x1e   : > { %581 = vmatprep.subr.bf16.mxu1 %v701_v3 }
  0x1f   : > { %p639_p12 = pnand %p638_p11, %p773_p5  ;;  %p646_p2 = por %p645_p1, %p644_p0 }
  0x21   : > { %583 = vmatpush3.bf16.msra.mxu1 %v582_v23  ;;  %p640_p13 = pneg %p639_p12 }
  0x22   : > { %584 = vmatprep.subr.bf16.mxu1 %v701_v3 }
  0x23   : > { %p647_p3 = pnand %p646_p2, %p640_p13 }
  0x25   : > { %586 = vmatpush3.bf16.msra.mxu1 %v585_v26 }
  0x26   : > { %587 = vmatprep.subr.bf16.mxu1 %v701_v3 }
  0x29   : > { %589 = vmatpush3.bf16.msra.mxu1 %v588_v29 }
  0x2a   : > { %590 = vmatprep.subr.bf16.mxu1 %v701_v3 }
  0x2d   : > { %592 = vmatpush3.bf16.msra.mxu1 %v591_v32 }
  0xed   : > { %v302_v34 = vpop.f32.mrb[0].mxu0 }
  0xee   : > { %v303_v35 = vadd.f32 %v488_v33, %v302_v34  ;;  %v527_v36 = vpop.f32.mrb[1].mxu0 }
  0xf0   : > { %v307_v37 = vmul.f32 %v303_v35, %v303_v35  ;;  %v306_v43 = vmul.f32 0.5, %v303_v35 }
  0xf2   : > { %v308_v38 = vmul.f32 %v307_v37, %v303_v35 }
  0xf4   : > { %v309_v39 = vmul.f32 0.044715, %v308_v38 }
  0xf6   : > { %v310_v40 = vadd.f32 %v309_v39, %v303_v35 }
  0xf8   : > { %v311_v41 = vmul.f32 0.7978846, %v310_v40 }
  0xfa   : > { %635 = vtanh.f32 %v311_v41 }
 0x104   : > { %v636_v42 = vpop.eup %635 }
 0x105   : > { %v313_v44 = vadd.f32 1.0, %v636_v42 }
 0x107   : > { %v314_v45 = vmul.f32 %v313_v44, %v306_v43 }
 0x109   : > { %561 = vmatmul.mubr.f32.vlgmr.msra.gmra.mrb[0].mxu1 %v314_v45 }
 0x1dc   : > { %v404_v47 = vpop.f32.mrb[0].mxu1 }
 0x1dd   : > { %v405_v48 = vadd.f32 %v490_v46, %v404_v47  ;;  %v562_v49 = vpop.f32.mrb[1].mxu1 }
 0x1df   : > { %408 = vst.msk [vmem:[%s215_s9] sm:$0xff] %vm232_vm1, %v405_v48 }
 0x1e0   : > { %650 = shalt.err (!%p647_p3)
}
 0x1e1   : > { %s651_s23 = scalar_lea.hbm %s860_s13, 128  ;;  %s655_s30 = scalar_lea.hbm %s908_s5, 256 }
 0x1e2   : > { %p652_p4 = scmp.ne.s32.totalorder %s860_s13, %s651_s23  ;;  %p656_p9 = scmp.lt.u32.totalorder %s860_s13, %s908_s5 }
 0x1e3   : > { %p657_p10 = scmp.lt.u32.totalorder %s655_s30, %s651_s23  ;;  %p659_p12 = scmp.lt.u32.totalorder %s651_s23, %s860_s13 }
 0x1e4   : > { %p653_p7 = pnand %p652_p4, %p773_p5 }
 0x1e5   : > { %p658_p11 = por %p657_p10, %p656_p9 }
 0x1e6   : > { %p654_p8 = pneg %p653_p7 }
 0x1e7   : > { %p660_p13 = por %p659_p12, %p658_p11 }
 0x1e9   : > { %p661_p0 = pnand %p660_p13, %p654_p8 }
 0x1eb   : > { %664 = shalt.err (!%p661_p0)
}
 0x1ec   : > { %593 = dma.vmem_to_hbm [thread:$0]  (%p773_p5), %s862_s10, 128, %s860_s13, %s410_s14  }
 0x1ed PF: > { %p599_p1 = scmp.ge.s32.totalorder %s699_s21, 2  ;;  %s435_s8 = sand.u32 1, %s687_s18  }
 0x1ee   : > { %s436_s9 = scalar_lea.sflag [#allocation3], %s435_s8 }
 0x1ef   : > { %p596_p2 = pnand %p599_p1, %p777_p6 }
 0x1f1   : > { %682 = dma.done.wait (!%p596_p2), %s436_s9, 128  }
 0x1f2   : > { %684 = vsyncadd (!%p596_p2), %s436_s9, 4294967168  ;;  %p15_p3 = scmp.ge.s32.totalorder %s760_s24, 4   ;;  %s911_s18 = smov %s691_s19 }
 0x1f3   : > { %s912_s19 = smov %s695_s20  ;;  %s913_s20 = smov %s771_s27 }
 0x1f4   : > { %s914_s21 = smov %s760_s24  ;;  %17 = sbr.rel (!%p15_p3) target bundleno = 3 (0x3), region = 75 }
 0x1fb   :  { %441 = vsyncpa [#allocation3], 1 }
 0x1fc   :  { %443 = vsyncpa [#allocation3 + $0x1], 1 }

</bundles_post_ra>
